<compile_context>
chip_gen: v7x
topology: tpu7x:2x2x1
jax: 0.10.0
libtpu: 0.0.40
codegen_flags: <defaults>
</compile_context>

<pallas_src>
import functools
import math

import jax
import jax.numpy as jnp
from jax.experimental import pallas as pl
from jax.experimental.pallas import tpu as pltpu

_LANE = 128
_SUBLANE = 8


def _round_up(n: int, m: int) -> int:
    return ((n + m - 1) // m) * m


def _cdiv(a: int, b: int) -> int:
    return (a + b - 1) // b


@functools.lru_cache(maxsize=None)
def _vmem_cap_bytes() -> int:
    """Usable per-core VMEM budget: physical capacity minus ~25% headroom."""
    try:
        cap = int(pltpu.get_tpu_info().vmem_capacity_bytes)
    except Exception:
        cap = 64 << 20  # conservative fallback (safe on every generation)
    return (cap * 3) // 4


def _const_spec(shape):
    """Weight/bias BlockSpec: same block every grid step -> VMEM-resident.

    Constant index_map means the block is fetched exactly once, so request
    single buffering to avoid doubling its resident footprint.
    """
    try:
        return pl.BlockSpec(shape, lambda i: (0, 0), pipeline_mode=pl.Buffered(1))
    except Exception:
        # Older API without pipeline_mode: fall back to default buffering.
        return pl.BlockSpec(shape, lambda i: (0, 0))


def _mlp_kernel(x_ref,
                w1_ref, b1_ref,
                w2_ref, b2_ref,
                w3_ref, b3_ref,
                w4_ref, b4_ref,
                o_ref):
    """4 chained MXU matmuls + f32 bias adds for one batch tile (no activation)."""
    cdt = w1_ref.dtype  # compute dtype of the MXU operands (f32 or bf16)
    h = jnp.dot(x_ref[...].astype(cdt), w1_ref[...],
                preferred_element_type=jnp.float32) + b1_ref[...]
    # activation_function(x) result is discarded in the reference -> no-op
    h = jnp.dot(h.astype(cdt), w2_ref[...],
                preferred_element_type=jnp.float32) + b2_ref[...]
    # activation_function(x) result is discarded in the reference -> no-op
    h = jnp.dot(h.astype(cdt), w3_ref[...],
                preferred_element_type=jnp.float32) + b3_ref[...]
    # activation_function(x) result is discarded in the reference -> no-op
    out = jnp.dot(h.astype(cdt), w4_ref[...],
                  preferred_element_type=jnp.float32) + b4_ref[...]
    o_ref[...] = out.astype(o_ref.dtype)


@functools.partial(jax.jit, static_argnames=("output_neurons",))
def simple_network_forward(x, params, *, output_neurons):
    """x: [B, input_neurons] f32; params: lane-padded w1..w4 (f32 or bf16), b1..b4 (f32)."""
    w1, b1 = params["w1"], params["b1"]
    w2, b2 = params["w2"], params["b2"]
    w3, b3 = params["w3"], params["b3"]
    w4, b4 = params["w4"], params["b4"]

    batch, d_in = x.shape
    hp = w1.shape[1]          # padded hidden width (multiple of 128)
    op = w4.shape[1]          # padded output width (multiple of 128)

    vmem_cap = _vmem_cap_bytes()

    # ---- batch tiling --------------------------------------------------
    # Balanced tiles (padding at most one sublane-rounded remainder), at least
    # 2 grid steps when batch > 8 so v7x's two TensorCores both get work.
    # Larger max tile on 128-MiB-VMEM parts (v5e/v6e) than on v7x.
    max_tile = 512 if vmem_cap >= (72 << 20) else 256
    n_steps = _cdiv(batch, max_tile)
    if batch > _SUBLANE:
        n_steps = max(n_steps, 2)
    tile_m = _round_up(_cdiv(batch, n_steps), _SUBLANE)
    batch_p = _round_up(batch, tile_m)
    if batch_p != batch:
        x = jnp.pad(x, ((0, batch_p - batch), (0, 0)))
    grid = (batch_p // tile_m,)

    # ---- VMEM budget ----------------------------------------------------
    weights = (w1, b1, w2, b2, w3, b3, w4, b4)
    param_bytes = sum(int(p.size) * p.dtype.itemsize for p in weights)
    if param_bytes > vmem_cap:
        # TODO(synk): for very large hidden widths, tile the K/N dims of each
        # layer over an "arbitrary" reduction grid axis (or split layers into
        # separate pallas_calls) instead of keeping all weights resident.
        raise ValueError(
            f"Resident weights ({param_bytes} B) exceed the VMEM budget "
            f"({vmem_cap} B); hidden width too large for the all-resident "
            "strategy.")

    io_tile_bytes = (tile_m * d_in + tile_m * op) * x.dtype.itemsize
    act_bytes = tile_m * max(hp, op) * 4           # f32 intermediate h
    vmem_needed = (param_bytes                     # weights: single-buffered
                   + 2 * io_tile_bytes             # x/out tiles: double-buffered
                   + 4 * act_bytes                 # compiler temps for h
                   + (4 << 20))                    # headroom
    vmem_limit = min(max(vmem_needed, 32 << 20), vmem_cap)

    flops = 2 * batch_p * (d_in * hp + 2 * hp * hp + hp * op)
    bytes_accessed = (param_bytes
                      + (batch_p * d_in + batch_p * op) * x.dtype.itemsize)

    out_padded = pl.pallas_call(
        _mlp_kernel,
        out_shape=jax.ShapeDtypeStruct((batch_p, op), x.dtype),
        grid_spec=pltpu.PrefetchScalarGridSpec(
            num_scalar_prefetch=0,
            grid=grid,
            in_specs=[
                pl.BlockSpec((tile_m, d_in), lambda i: (i, 0)),     # x tile
                _const_spec((d_in, hp)), _const_spec((1, hp)),      # layer 1
                _const_spec((hp, hp)), _const_spec((1, hp)),        # layer 2
                _const_spec((hp, hp)), _const_spec((1, hp)),        # layer 3
                _const_spec((hp, op)), _const_spec((1, op)),        # layer 4
            ],
            out_specs=pl.BlockSpec((tile_m, op), lambda i: (i, 0)),
        ),
        compiler_params=pltpu.CompilerParams(
            dimension_semantics=("parallel",),
            vmem_limit_bytes=int(vmem_limit),
        ),
        cost_estimate=pl.CostEstimate(
            flops=int(flops),
            transcendentals=0,
            bytes_accessed=int(bytes_accessed)),
    )(x, *weights)

    # Strip batch padding and the lane-padding of the output features.
    return out_padded[:batch, :output_neurons]


def init_params(key, input_neurons, hidden_neurons, output_neurons,
                compute_dtype=jnp.bfloat16):
    """nn.Linear-style U(-1/sqrt(fan_in), 1/sqrt(fan_in)) init.

    Returns (padded_params, raw_params):
      * padded_params: weights [in_padded, out_padded] with hidden/output dims
        zero-padded to multiples of 128 (lane-dense MXU tiles, unmasked
        stores), stored in `compute_dtype` (bf16 for MXU throughput / half the
        DMA, f32 for exact-tolerance matching).  Biases stay f32 [1, out_padded].
      * raw_params: unpadded f32 weights/biases for the pure-JAX reference.
    Zero padding is exact: padded hidden columns stay 0 through every layer and
    padded output columns are sliced off by the wrapper.
    """
    dims = [(input_neurons, hidden_neurons),
            (hidden_neurons, hidden_neurons),
            (hidden_neurons, hidden_neurons),
            (hidden_neurons, output_neurons)]
    padded, raw = {}, {}
    for i, (fan_in, fan_out) in enumerate(dims, start=1):
        key, kw, kb = jax.random.split(key, 3)
        bound = 1.0 / math.sqrt(fan_in)
        w = jax.random.uniform(kw, (fan_in, fan_out), jnp.float32,
                               minval=-bound, maxval=bound)
        b = jax.random.uniform(kb, (1, fan_out), jnp.float32,
                               minval=-bound, maxval=bound)
        raw[f"w{i}"], raw[f"b{i}"] = w, b
        in_p = fan_in if i == 1 else _round_up(fan_in, _LANE)
        out_p = _round_up(fan_out, _LANE)
        w_pad = jnp.zeros((in_p, out_p), jnp.float32).at[:fan_in, :fan_out].set(w)
        b_pad = jnp.zeros((1, out_p), jnp.float32).at[:, :fan_out].set(b)
        padded[f"w{i}"] = w_pad.astype(compute_dtype)
        padded[f"b{i}"] = b_pad          # biases kept f32 (tiny; f32 bias adds)
    return padded, raw


def reference_forward(x, params):
    """Pure-JAX f32 reference matching the PyTorch forward exactly (no activation)."""
    h = x @ params["w1"] + params["b1"]
    h = h @ params["w2"] + params["b2"]
    h = h @ params["w3"] + params["b3"]
    return h @ params["w4"] + params["b4"]


if __name__ == "__main__":
    input_neurons, hidden_neurons, output_neurons = 32, 32, 16
    batch = 8

    key = jax.random.PRNGKey(0)
    key, kx = jax.random.split(key)
    x = jax.random.normal(kx, (batch, input_neurons), jnp.float32)

    # Exact path: f32 operands, matches the f32 PyTorch reference to 1e-4.
    padded_f32, raw_params = init_params(
        key, input_neurons, hidden_neurons, output_neurons,
        compute_dtype=jnp.float32)
    out = jax.block_until_ready(
        simple_network_forward(x, padded_f32, output_neurons=output_neurons))
    ref = reference_forward(x, raw_params)
    assert out.shape == (batch, output_neurons)
    assert jnp.allclose(out, ref, atol=1e-4, rtol=1e-4), \
        float(jnp.max(jnp.abs(out - ref)))

    # Fast path: bf16 operands with f32 accumulation (2-4x MXU, half weight DMA).
    padded_bf16, _ = init_params(
        key, input_neurons, hidden_neurons, output_neurons,
        compute_dtype=jnp.bfloat16)
    out_bf16 = jax.block_until_ready(
        simple_network_forward(x, padded_bf16, output_neurons=output_neurons))
    assert out_bf16.shape == (batch, output_neurons)
    assert jnp.allclose(out_bf16, ref, atol=5e-2, rtol=5e-2), \
        float(jnp.max(jnp.abs(out_bf16 - ref)))

    print("KERNEL_OK")
</pallas_src>

<mosaic_0001>
module attributes {stable_mosaic.version = 11 : i64} {
  func.func @_mlp_kernel(%arg0: i32, %arg1: memref<8x32xf32, #tpu.memory_space<vmem>>, %arg2: memref<32x128xf32, #tpu.memory_space<vmem>>, %arg3: memref<1x128xf32, #tpu.memory_space<vmem>>, %arg4: memref<128x128xf32, #tpu.memory_space<vmem>>, %arg5: memref<1x128xf32, #tpu.memory_space<vmem>>, %arg6: memref<128x128xf32, #tpu.memory_space<vmem>>, %arg7: memref<1x128xf32, #tpu.memory_space<vmem>>, %arg8: memref<128x128xf32, #tpu.memory_space<vmem>>, %arg9: memref<1x128xf32, #tpu.memory_space<vmem>>, %arg10: memref<8x128xf32, #tpu.memory_space<vmem>>) attributes {dimension_semantics = [#tpu.dimension_semantics<parallel>], iteration_bounds = array<i64: 1>, scalar_prefetch = 0 : i64, scratch_operands = 0 : i64, tpu.core_type = #tpu.core_type<tc>, window_params = [{transform_indices = @transform_0, window_bounds = array<i64: 8, 32>}, {pipeline_mode = #tpu.pipeline_mode<synchronous>, transform_indices = @transform_1, window_bounds = array<i64: 32, 128>}, {pipeline_mode = #tpu.pipeline_mode<synchronous>, transform_indices = @transform_2, window_bounds = array<i64: 1, 128>}, {pipeline_mode = #tpu.pipeline_mode<synchronous>, transform_indices = @transform_3, window_bounds = array<i64: 128, 128>}, {pipeline_mode = #tpu.pipeline_mode<synchronous>, transform_indices = @transform_4, window_bounds = array<i64: 1, 128>}, {pipeline_mode = #tpu.pipeline_mode<synchronous>, transform_indices = @transform_5, window_bounds = array<i64: 128, 128>}, {pipeline_mode = #tpu.pipeline_mode<synchronous>, transform_indices = @transform_6, window_bounds = array<i64: 1, 128>}, {pipeline_mode = #tpu.pipeline_mode<synchronous>, transform_indices = @transform_7, window_bounds = array<i64: 128, 128>}, {pipeline_mode = #tpu.pipeline_mode<synchronous>, transform_indices = @transform_8, window_bounds = array<i64: 1, 128>}, {transform_indices = @transform_9, window_bounds = array<i64: 8, 128>}]} {
    %c0 = arith.constant 0 : index
    %c0_0 = arith.constant 0 : index
    %0 = vector.load %arg1[%c0, %c0_0] : memref<8x32xf32, #tpu.memory_space<vmem>>, vector<8x32xf32>
    %c0_1 = arith.constant 0 : index
    %c0_2 = arith.constant 0 : index
    %1 = vector.load %arg2[%c0_1, %c0_2] : memref<32x128xf32, #tpu.memory_space<vmem>>, vector<32x128xf32>
    %cst = arith.constant dense<0.000000e+00> : vector<8x128xf32>
    %2 = tpu.matmul %0, %1, %cst {dimension_numbers = #tpu.dot_dimension_numbers<[1], [0], [0], [1], [0, 0, 1, 1], [], []>} : vector<8x32xf32>, vector<32x128xf32>, vector<8x128xf32> -> vector<8x128xf32>
    %c0_3 = arith.constant 0 : index
    %c0_4 = arith.constant 0 : index
    %3 = vector.load %arg3[%c0_3, %c0_4] : memref<1x128xf32, #tpu.memory_space<vmem>>, vector<1x128xf32>
    %4 = vector.broadcast %3 : vector<1x128xf32> to vector<8x128xf32>
    %5 = arith.addf %2, %4 : vector<8x128xf32>
    %c0_5 = arith.constant 0 : index
    %c0_6 = arith.constant 0 : index
    %6 = vector.load %arg4[%c0_5, %c0_6] : memref<128x128xf32, #tpu.memory_space<vmem>>, vector<128x128xf32>
    %cst_7 = arith.constant dense<0.000000e+00> : vector<8x128xf32>
    %7 = tpu.matmul %5, %6, %cst_7 {dimension_numbers = #tpu.dot_dimension_numbers<[1], [0], [0], [1], [0, 0, 1, 1], [], []>} : vector<8x128xf32>, vector<128x128xf32>, vector<8x128xf32> -> vector<8x128xf32>
    %c0_8 = arith.constant 0 : index
    %c0_9 = arith.constant 0 : index
    %8 = vector.load %arg5[%c0_8, %c0_9] : memref<1x128xf32, #tpu.memory_space<vmem>>, vector<1x128xf32>
    %9 = vector.broadcast %8 : vector<1x128xf32> to vector<8x128xf32>
    %10 = arith.addf %7, %9 : vector<8x128xf32>
    %c0_10 = arith.constant 0 : index
    %c0_11 = arith.constant 0 : index
    %11 = vector.load %arg6[%c0_10, %c0_11] : memref<128x128xf32, #tpu.memory_space<vmem>>, vector<128x128xf32>
    %cst_12 = arith.constant dense<0.000000e+00> : vector<8x128xf32>
    %12 = tpu.matmul %10, %11, %cst_12 {dimension_numbers = #tpu.dot_dimension_numbers<[1], [0], [0], [1], [0, 0, 1, 1], [], []>} : vector<8x128xf32>, vector<128x128xf32>, vector<8x128xf32> -> vector<8x128xf32>
    %c0_13 = arith.constant 0 : index
    %c0_14 = arith.constant 0 : index
    %13 = vector.load %arg7[%c0_13, %c0_14] : memref<1x128xf32, #tpu.memory_space<vmem>>, vector<1x128xf32>
    %14 = vector.broadcast %13 : vector<1x128xf32> to vector<8x128xf32>
    %15 = arith.addf %12, %14 : vector<8x128xf32>
    %c0_15 = arith.constant 0 : index
    %c0_16 = arith.constant 0 : index
    %16 = vector.load %arg8[%c0_15, %c0_16] : memref<128x128xf32, #tpu.memory_space<vmem>>, vector<128x128xf32>
    %cst_17 = arith.constant dense<0.000000e+00> : vector<8x128xf32>
    %17 = tpu.matmul %15, %16, %cst_17 {dimension_numbers = #tpu.dot_dimension_numbers<[1], [0], [0], [1], [0, 0, 1, 1], [], []>} : vector<8x128xf32>, vector<128x128xf32>, vector<8x128xf32> -> vector<8x128xf32>
    %c0_18 = arith.constant 0 : index
    %c0_19 = arith.constant 0 : index
    %18 = vector.load %arg9[%c0_18, %c0_19] : memref<1x128xf32, #tpu.memory_space<vmem>>, vector<1x128xf32>
    %19 = vector.broadcast %18 : vector<1x128xf32> to vector<8x128xf32>
    %20 = arith.addf %17, %19 : vector<8x128xf32>
    %c0_20 = arith.constant 0 : index
    %c0_21 = arith.constant 0 : index
    %21 = vector.load %arg10[%c0_20, %c0_21] : memref<8x128xf32, #tpu.memory_space<vmem>>, vector<8x128xf32>
    tpu.vector_store %arg10[%c0_20, %c0_21], %20 {strides = array<i32>} : memref<8x128xf32, #tpu.memory_space<vmem>>, vector<8x128xf32>,
    return
  }
  func.func @transform_0(%arg0: i32) -> (i32, i32) {
    %c0_i32 = arith.constant 0 : i32
    %c0_i32_0 = arith.constant 0 : i32
    return %arg0, %c0_i32 : i32, i32
  }
  func.func @transform_1(%arg0: i32) -> (i32, i32) {
    %c0_i32 = arith.constant 0 : i32
    %c0_i32_0 = arith.constant 0 : i32
    %c0_i32_1 = arith.constant 0 : i32
    return %c0_i32, %c0_i32_0 : i32, i32
  }
  func.func @transform_2(%arg0: i32) -> (i32, i32) {
    %c0_i32 = arith.constant 0 : i32
    %c0_i32_0 = arith.constant 0 : i32
    %c0_i32_1 = arith.constant 0 : i32
    return %c0_i32, %c0_i32_0 : i32, i32
  }
  func.func @transform_3(%arg0: i32) -> (i32, i32) {
    %c0_i32 = arith.constant 0 : i32
    %c0_i32_0 = arith.constant 0 : i32
    %c0_i32_1 = arith.constant 0 : i32
    return %c0_i32, %c0_i32_0 : i32, i32
  }
  func.func @transform_4(%arg0: i32) -> (i32, i32) {
    %c0_i32 = arith.constant 0 : i32
    %c0_i32_0 = arith.constant 0 : i32
    %c0_i32_1 = arith.constant 0 : i32
    return %c0_i32, %c0_i32_0 : i32, i32
  }
  func.func @transform_5(%arg0: i32) -> (i32, i32) {
    %c0_i32 = arith.constant 0 : i32
    %c0_i32_0 = arith.constant 0 : i32
    %c0_i32_1 = arith.constant 0 : i32
    return %c0_i32, %c0_i32_0 : i32, i32
  }
  func.func @transform_6(%arg0: i32) -> (i32, i32) {
    %c0_i32 = arith.constant 0 : i32
    %c0_i32_0 = arith.constant 0 : i32
    %c0_i32_1 = arith.constant 0 : i32
    return %c0_i32, %c0_i32_0 : i32, i32
  }
  func.func @transform_7(%arg0: i32) -> (i32, i32) {
    %c0_i32 = arith.constant 0 : i32
    %c0_i32_0 = arith.constant 0 : i32
    %c0_i32_1 = arith.constant 0 : i32
    return %c0_i32, %c0_i32_0 : i32, i32
  }
  func.func @transform_8(%arg0: i32) -> (i32, i32) {
    %c0_i32 = arith.constant 0 : i32
    %c0_i32_0 = arith.constant 0 : i32
    %c0_i32_1 = arith.constant 0 : i32
    return %c0_i32, %c0_i32_0 : i32, i32
  }
  func.func @transform_9(%arg0: i32) -> (i32, i32) {
    %c0_i32 = arith.constant 0 : i32
    %c0_i32_0 = arith.constant 0 : i32
    return %arg0, %c0_i32 : i32, i32
  }
}

</mosaic_0001>

<bundles_post_ra>
// kernel: simple_network_forward.1
= control target key start
LH: loop header
LB: loop body
LE: loop exit
PB: predicated region body
PF: predicated region fallthrough
CT: control target
= control target key end

     0   :  { %14 = vsyncpa [#allocation3], 0  ;;  %s1079_s0 = inlined_call_operand.hbm [shape: f32[8,32], index: 0, kind: input, shape index: {}]   ;;  %s1080_s1 = inlined_call_operand.hbm [shape: f32[32,128], index: 1, kind: input, shape index: {}]   ;;  %s1081_s2 = inlined_call_operand.vmem [shape: f32[1,128], index: 2, kind: input, shape index: {}]   ;;  %s1082_s3 = inlined_call_operand.hbm [shape: f32[128,128], index: 3, kind: input, shape index: {}]   ;;  %s1083_s4 = inlined_call_operand.vmem [shape: f32[1,128], index: 4, kind: input, shape index: {}]   ;;  %s1084_s5 = inlined_call_operand.hbm [shape: f32[128,128], index: 5, kind: input, shape index: {}]   ;;  %s1085_s6 = inlined_call_operand.vmem [shape: f32[1,128], index: 6, kind: input, shape index: {}]   ;;  %s1086_s7 = inlined_call_operand.hbm [shape: f32[128,128], index: 7, kind: input, shape index: {}]   ;;  %s1087_s8 = inlined_call_operand.vmem [shape: f32[1,128], index: 8, kind: input, shape index: {}]   ;;  %s1088_s9 = inlined_call_operand.hbm [shape: f32[8,128], index: 9, kind: output, shape index: {}]  }
   0x1   :  { %15 = vsyncpa [#allocation6], 0 }
   0x2   :  { %16 = vsyncpa [#allocation9], 0 }
   0x3   :  { %17 = vsyncpa [#allocation4], 0  ;;  %s888_s30 = smov [#allocation5]   ;;  %s748_s13 = scalar_lea.hbm %s1080_s1, 512 }
   0x4   :  { %s33_s10 = sshll.u32 %s888_s30, 4  ;;  %p749_p0 = scmp.ne.s32.totalorder %s1080_s1, %s748_s13  ;;  %s34_s10 = int_to_ptr.vmem [resolvable:$true] %s33_s10 }
   0x5   :  { %p752_p1 = scmp.lt.u32.totalorder %s748_s13, %s1080_s1 }
   0x7   :  { %p754_p2 = pnand %p752_p1, %p749_p0 }
   0x9   :  { %757 = shalt.err (!%p754_p2)
}
   0xa   :  { %s758_s18 = scalar_lea.vmem %s34_s10, 512  ;;  %p763_p4 = scmp.lt.s32.totalorder %s34_s10, %s34_s10 }
   0xb   :  { %p759_p3 = scmp.ne.s32.totalorder %s34_s10, %s758_s18  ;;  %p764_p5 = scmp.lt.s32.totalorder %s758_s18, %s758_s18 }
   0xd   :  { %p765_p6 = por %p764_p5, %p763_p4 }
   0xf   :  { %p766_p7 = pnand %p765_p6, %p759_p3 }
  0x11   :  { %769 = shalt.err (!%p766_p7)
}
  0x12   :  { %s889_s19 = smov 128   ;;  %s890_s20 = smov 8  }
  0x13   :  { %39 = dma.hbm_to_vmem [thread:$0]  %s1080_s1, 512, %s34_s10, [#allocation6], %s889_s19, %s889_s19, %s890_s20  }
  0x14   :  { %s891_s23 = smov [#allocation8]   ;;  %s892_s25 = smov [#allocation2]  }
  0x15   :  { %s61_s24 = sshll.u32 %s891_s23, 4  ;;  %s24_s26 = sshll.u32 %s892_s25, 4  ;;  %s62_s24 = int_to_ptr.vmem [resolvable:$true] %s61_s24  ;;  %s25_s26 = int_to_ptr.vmem [resolvable:$true] %s24_s26 }
  0x16   :  { %s770_s29 = scalar_lea.hbm %s1084_s5, 2048 }
  0x17   :  { %p771_p8 = scmp.ne.s32.totalorder %s1084_s5, %s770_s29  ;;  %p774_p9 = scmp.lt.u32.totalorder %s770_s29, %s1084_s5 }
  0x19   :  { %p776_p10 = pnand %p774_p9, %p771_p8 }
  0x1b   :  { %779 = shalt.err (!%p776_p10)
}
  0x1c   :  { %s780_s1 = scalar_lea.vmem %s62_s24, 2048  ;;  %p785_p12 = scmp.lt.s32.totalorder %s62_s24, %s62_s24 }
  0x1d   :  { %p781_p11 = scmp.ne.s32.totalorder %s62_s24, %s780_s1  ;;  %p786_p13 = scmp.lt.s32.totalorder %s780_s1, %s780_s1 }
  0x1f   :  { %p787_p0 = por %p786_p13, %p785_p12 }
  0x21   :  { %p788_p1 = pnand %p787_p0, %p781_p11 }
  0x23   :  { %791 = shalt.err (!%p788_p1)
}
  0x24   :  { %67 = dma.hbm_to_vmem [thread:$0]  %s1084_s5, 2048, %s62_s24, [#allocation9], %s889_s19, %s889_s19, %s890_s20  }
  0x25   :  { %s792_s17 = scalar_lea.hbm %s1079_s0, 128 }
  0x26   :  { %p793_p2 = scmp.ne.s32.totalorder %s1079_s0, %s792_s17  ;;  %p796_p3 = scmp.lt.u32.totalorder %s792_s17, %s1079_s0 }
  0x28   :  { %p798_p4 = pnand %p796_p3, %p793_p2 }
  0x2a   :  { %801 = shalt.err (!%p798_p4)
}
  0x2b   :  { %s802_s25 = scalar_lea.vmem %s25_s26, 128  ;;  %p807_p6 = scmp.lt.s32.totalorder %s25_s26, %s25_s26 }
  0x2c   :  { %p803_p5 = scmp.ne.s32.totalorder %s25_s26, %s802_s25  ;;  %p808_p7 = scmp.lt.s32.totalorder %s802_s25, %s802_s25 }
  0x2e   :  { %p809_p8 = por %p808_p7, %p807_p6 }
  0x30   :  { %p810_p9 = pnand %p809_p8, %p803_p5 }
  0x32   :  { %813 = shalt.err (!%p810_p9)
}
  0x33   :  { %27 = dma.hbm_to_vmem [thread:$0]  %s1079_s0, 128, %s25_s26, [#allocation3]  }
  0x34   :  { %s893_s27 = smov [#allocation7]   ;;  %s894_s29 = smov [#allocation10]  }
  0x35   :  { %s47_s28 = sshll.u32 %s893_s27, 4  ;;  %s75_s30 = sshll.u32 %s894_s29, 4  ;;  %s48_s28 = int_to_ptr.vmem [resolvable:$true] %s47_s28  ;;  %s76_s30 = int_to_ptr.vmem [resolvable:$true] %s75_s30 }
  0x36   :  { %s814_s13 = scalar_lea.hbm %s1082_s3, 2048 }
  0x37   :  { %p815_p10 = scmp.ne.s32.totalorder %s1082_s3, %s814_s13  ;;  %p818_p11 = scmp.lt.u32.totalorder %s814_s13, %s1082_s3 }
  0x39   :  { %p820_p12 = pnand %p818_p11, %p815_p10 }
  0x3b   :  { %823 = shalt.err (!%p820_p12)
}
  0x3c   :  { %s824_s0 = scalar_lea.vmem %s48_s28, 2048  ;;  %p829_p0 = scmp.lt.s32.totalorder %s48_s28, %s48_s28 }
  0x3d   :  { %p825_p13 = scmp.ne.s32.totalorder %s48_s28, %s824_s0  ;;  %p830_p1 = scmp.lt.s32.totalorder %s824_s0, %s824_s0 }
  0x3f   :  { %p831_p2 = por %p830_p1, %p829_p0 }
  0x41   :  { %p832_p3 = pnand %p831_p2, %p825_p13 }
  0x43   :  { %835 = shalt.err (!%p832_p3)
}
  0x44   :  { %53 = dma.hbm_to_vmem [thread:$0]  %s1082_s3, 2048, %s48_s28, [#allocation6], %s889_s19, %s889_s19, %s890_s20  }
  0x45   :  { %s836_s21 = scalar_lea.hbm %s1086_s7, 2048 }
  0x46   :  { %p837_p4 = scmp.ne.s32.totalorder %s1086_s7, %s836_s21  ;;  %p840_p5 = scmp.lt.u32.totalorder %s836_s21, %s1086_s7 }
  0x48   :  { %p842_p6 = pnand %p840_p5, %p837_p4 }
  0x4a   :  { %845 = shalt.err (!%p842_p6)
}
  0x4b   :  { %s846_s24 = scalar_lea.vmem %s76_s30, 2048  ;;  %p851_p8 = scmp.lt.s32.totalorder %s76_s30, %s76_s30 }
  0x4c   :  { %p847_p7 = scmp.ne.s32.totalorder %s76_s30, %s846_s24  ;;  %p852_p9 = scmp.lt.s32.totalorder %s846_s24, %s846_s24 }
  0x4e   :  { %p853_p10 = por %p852_p9, %p851_p8 }
  0x50   :  { %p854_p11 = pnand %p853_p10, %p847_p7 }
  0x52   :  { %857 = shalt.err (!%p854_p11)
}
  0x53   :  { %81 = dma.hbm_to_vmem [thread:$0]  %s1086_s7, 2048, %s76_s30, [#allocation9], %s889_s19, %s889_s19, %s890_s20  }
  0x54   :  { %880 = dma.done.wait [#allocation3], 128  }
  0x55   :  { %881 = vsyncadd [#allocation3], 4294967168 }
  0x56   :  { %882 = dma.done.wait [#allocation6], 2560  }
  0x57   :  { %883 = vsyncadd [#allocation6], 4294964736 }
  0x58   :  { %884 = dma.done.wait [#allocation9], 4096  }
  0x59   :  { %885 = vsyncadd [#allocation9], 4294963200  ;;  %v895_v0 = vmov 0.0|0.0   ;;  %vm896_vm0 = vmmov 0   ;;  %v897_v1 = vmov 0.0   ;;  %v100_v2 = vld [vmem:[#allocation5] sm:$0xff] }
  0x5a   :  { %659 = vmatprep.subr.bf16.mxu0 %v895_v0  ;;  %551 = vmatprep.mubr.msk.f32.mxu0 %vm896_vm0, %v897_v1  ;;  %v101_v3 = vld [vmem:[#allocation5 + $0x8] sm:$0xff]  ;;  %v102_v4 = vld [vmem:[#allocation5 + $0x10] sm:$0xff]  ;;  %v103_v6 = vld [vmem:[#allocation5 + $0x18] sm:$0xff]  ;;  %vm111_vm1 = vcmask 261120  }
  0x5b   :  { %665 = vmatprep.subr.bf16.mxu1 %v895_v0  ;;  %586 = vmatprep.mubr.msk.f32.mxu1 %vm896_vm0, %v897_v1  ;;  %v660_v5 = vpack.c.bf16 %v101_v3, %v100_v2  ;;  %v185_v7 = vld [vmem:[#allocation7] sm:$0xff]  ;;  %v186_v8 = vld [vmem:[#allocation7 + $0x8] sm:$0xff]  ;;  %v187_v9 = vld [vmem:[#allocation7 + $0x10] sm:$0xff]  ;;  %v663_v11 = vpack.c.bf16 %v103_v6, %v102_v4 }
  0x5c   :  { %v188_v10 = vld [vmem:[#allocation7 + $0x18] sm:$0xff]  ;;  %v666_v12 = vpack.c.bf16 %v186_v8, %v185_v7  ;;  %v189_v14 = vld [vmem:[#allocation7 + $0x20] sm:$0xff]  ;;  %v190_v15 = vld [vmem:[#allocation7 + $0x28] sm:$0xff] }
  0x5d   :  { %661 = vmatpush3.bf16.msra.mxu0 %v660_v5  ;;  %v669_v13 = vpack.c.bf16 %v188_v10, %v187_v9  ;;  %v99_v16 = vld [vmem:[#allocation2] sm:$0xff]  ;;  %v672_v17 = vpack.c.bf16 %v190_v15, %v189_v14  ;;  %v191_v18 = vld [vmem:[#allocation7 + $0x30] sm:$0xff]  ;;  %v193_v21 = vld [vmem:[#allocation7 + $0x40] sm:$0xff] }
  0x5e   :  { %662 = vmatprep.subr.bf16.mxu0 %v895_v0  ;;  %667 = vmatpush3.bf16.msra.mxu1 %v666_v12  ;;  %v192_v19 = vld [vmem:[#allocation7 + $0x38] sm:$0xff]  ;;  %v194_v22 = vld [vmem:[#allocation7 + $0x48] sm:$0xff]  ;;  %v195_v24 = vld [vmem:[#allocation7 + $0x50] sm:$0xff] }
  0x5f   :  { %668 = vmatprep.subr.bf16.mxu1 %v895_v0  ;;  %v675_v20 = vpack.c.bf16 %v192_v19, %v191_v18  ;;  %v678_v23 = vpack.c.bf16 %v194_v22, %v193_v21  ;;  %v196_v25 = vld [vmem:[#allocation7 + $0x58] sm:$0xff]  ;;  %v197_v27 = vld [vmem:[#allocation7 + $0x60] sm:$0xff]  ;;  %v198_v28 = vld [vmem:[#allocation7 + $0x68] sm:$0xff] }
  0x60   :  { %v681_v26 = vpack.c.bf16 %v196_v25, %v195_v24  ;;  %v684_v29 = vpack.c.bf16 %v198_v28, %v197_v27  ;;  %v199_v30 = vld [vmem:[#allocation7 + $0x70] sm:$0xff]  ;;  %v200_v31 = vld [vmem:[#allocation7 + $0x78] sm:$0xff]  ;;  %v278_v33 = vld [vmem:[#allocation8] sm:$0xff] }
  0x61   :  { %664 = vmatpush3.bf16.msra.mxu0 %v663_v11  ;;  %v687_v32 = vpack.c.bf16 %v200_v31, %v199_v30  ;;  %v279_v34 = vld [vmem:[#allocation8 + $0x8] sm:$0xff]  ;;  %v280_v35 = vld [vmem:[#allocation8 + $0x10] sm:$0xff]  ;;  %v281_v37 = vld [vmem:[#allocation8 + $0x18] sm:$0xff] }
  0x62   :  { %689 = vmatprep.subr.bf16.mxu0 %v895_v0  ;;  %670 = vmatpush3.bf16.msra.mxu1 %v669_v13  ;;  %v690_v36 = vpack.c.bf16 %v279_v34, %v278_v33  ;;  %v693_v38 = vpack.c.bf16 %v281_v37, %v280_v35  ;;  %v282_v39 = vld [vmem:[#allocation8 + $0x20] sm:$0xff]  ;;  %v283_v40 = vld [vmem:[#allocation8 + $0x28] sm:$0xff]  ;;  %v284_v42 = vld [vmem:[#allocation8 + $0x30] sm:$0xff] }
  0x63   :  { %671 = vmatprep.subr.bf16.mxu1 %v895_v0  ;;  %v696_v41 = vpack.c.bf16 %v283_v40, %v282_v39  ;;  %v285_v43 = vld [vmem:[#allocation8 + $0x38] sm:$0xff]  ;;  %v286_v45 = vld [vmem:[#allocation8 + $0x40] sm:$0xff]  ;;  %v287_v46 = vld [vmem:[#allocation8 + $0x48] sm:$0xff] }
  0x64   :  { %552 = vmatmul.mubr.msk.f32.vlgmr.msra.gmra.mrb[0].mxu0 %vm111_vm1, %v99_v16  ;;  %v699_v44 = vpack.c.bf16 %v285_v43, %v284_v42  ;;  %v702_v47 = vpack.c.bf16 %v287_v46, %v286_v45  ;;  %v288_v48 = vld [vmem:[#allocation8 + $0x50] sm:$0xff]  ;;  %v289_v49 = vld [vmem:[#allocation8 + $0x58] sm:$0xff]  ;;  %v290_v51 = vld [vmem:[#allocation8 + $0x60] sm:$0xff] }
  0x65   :  { %621 = vmatprep.mubr.msk.f32.mxu0 %vm896_vm0, %v897_v1  ;;  %691 = vmatpush3.bf16.msra.mxu0 %v690_v36  ;;  %v705_v50 = vpack.c.bf16 %v289_v49, %v288_v48  ;;  %v291_v52 = vld [vmem:[#allocation8 + $0x68] sm:$0xff]  ;;  %v482_v54 = vld [vmem:[%s1081_s2] ss:$0 sm:$0xff]  ;;  %v292_v58 = vld [vmem:[#allocation8 + $0x70] sm:$0xff] }
  0x66   :  { %673 = vmatpush3.bf16.msra.mxu1 %v672_v17  ;;  %692 = vmatprep.subr.bf16.mxu0 %v895_v0  ;;  %v708_v53 = vpack.c.bf16 %v291_v52, %v290_v51  ;;  %v293_v59 = vld [vmem:[#allocation8 + $0x78] sm:$0xff]  ;;  %v371_v61 = vld [vmem:[#allocation10] sm:$0xff]  ;;  %v372_v62 = vld [vmem:[#allocation10 + $0x8] sm:$0xff] }
  0x67   :  { %674 = vmatprep.subr.bf16.mxu1 %v895_v0  ;;  %v711_v60 = vpack.c.bf16 %v293_v59, %v292_v58  ;;  %v373_v63 = vld [vmem:[#allocation10 + $0x10] sm:$0xff]  ;;  %v714_v2 = vpack.c.bf16 %v372_v62, %v371_v61  ;;  %v374_v3 = vld [vmem:[#allocation10 + $0x18] sm:$0xff]  ;;  %v375_v5 = vld [vmem:[#allocation10 + $0x20] sm:$0xff] }
  0x68   :  { %v717_v4 = vpack.c.bf16 %v374_v3, %v373_v63  ;;  %v376_v6 = vld [vmem:[#allocation10 + $0x28] sm:$0xff]  ;;  %v378_v8 = vld [vmem:[#allocation10 + $0x38] sm:$0xff]  ;;  %v379_v10 = vld [vmem:[#allocation10 + $0x40] sm:$0xff] }
  0x69   :  { %694 = vmatpush3.bf16.msra.mxu0 %v693_v38  ;;  %v720_v7 = vpack.c.bf16 %v376_v6, %v375_v5  ;;  %v380_v11 = vld [vmem:[#allocation10 + $0x48] sm:$0xff]  ;;  %v381_v13 = vld [vmem:[#allocation10 + $0x50] sm:$0xff]  ;;  %v382_v14 = vld [vmem:[#allocation10 + $0x58] sm:$0xff] }
  0x6a   :  { %676 = vmatpush3.bf16.msra.mxu1 %v675_v20  ;;  %695 = vmatprep.subr.bf16.mxu0 %v895_v0  ;;  %v726_v12 = vpack.c.bf16 %v380_v11, %v379_v10  ;;  %v729_v15 = vpack.c.bf16 %v382_v14, %v381_v13  ;;  %v383_v16 = vld [vmem:[#allocation10 + $0x60] sm:$0xff]  ;;  %v384_v17 = vld [vmem:[#allocation10 + $0x68] sm:$0xff]  ;;  %v484_v19 = vld [vmem:[%s1083_s4] ss:$0 sm:$0xff]  ;;  %s898_s4 = smov [#allocation11]  }
  0x6b   :  { %677 = vmatprep.subr.bf16.mxu1 %v895_v0  ;;  %v732_v18 = vpack.c.bf16 %v384_v17, %v383_v16  ;;  %v386_v24 = vld [vmem:[#allocation10 + $0x78] sm:$0xff]  ;;  %s471_s12 = sshll.u32 %s898_s4, 4  ;;  %s472_s12 = int_to_ptr.vmem [resolvable:$true] %s471_s12 }
  0x6c   :  { %s858_s13 = scalar_lea.vmem %s472_s12, 128  ;;  %p863_p13 = scmp.lt.s32.totalorder %s472_s12, %s472_s12 }
  0x6d   :  { %697 = vmatpush3.bf16.msra.mxu0 %v696_v41  ;;  %p859_p12 = scmp.ne.s32.totalorder %s472_s12, %s858_s13  ;;  %p864_p0 = scmp.lt.s32.totalorder %s858_s13, %s858_s13 }
  0x6e   :  { %679 = vmatpush3.bf16.msra.mxu1 %v678_v23  ;;  %698 = vmatprep.subr.bf16.mxu0 %v895_v0  ;;  %v385_v23 = vld [vmem:[#allocation10 + $0x70] sm:$0xff] }
  0x6f   :  { %680 = vmatprep.subr.bf16.mxu1 %v895_v0  ;;  %v735_v25 = vpack.c.bf16 %v386_v24, %v385_v23  ;;  %p865_p1 = por %p864_p0, %p863_p13 }
  0x71   :  { %700 = vmatpush3.bf16.msra.mxu0 %v699_v44  ;;  %p866_p2 = pnand %p865_p1, %p859_p12 }
  0x72   :  { %682 = vmatpush3.bf16.msra.mxu1 %v681_v26  ;;  %701 = vmatprep.subr.bf16.mxu0 %v895_v0  ;;  %v485_v26 = vld [vmem:[%s1085_s6] ss:$0 sm:$0xff] }
  0x73   :  { %683 = vmatprep.subr.bf16.mxu1 %v895_v0 }
  0x75   :  { %703 = vmatpush3.bf16.msra.mxu0 %v702_v47 }
  0x76   :  { %685 = vmatpush3.bf16.msra.mxu1 %v684_v29  ;;  %704 = vmatprep.subr.bf16.mxu0 %v895_v0 }
  0x77   :  { %686 = vmatprep.subr.bf16.mxu1 %v895_v0 }
  0x79   :  { %706 = vmatpush3.bf16.msra.mxu0 %v705_v50 }
  0x7a   :  { %688 = vmatpush3.bf16.msra.mxu1 %v687_v32  ;;  %707 = vmatprep.subr.bf16.mxu0 %v895_v0 }
  0x7b   :  { %713 = vmatprep.subr.bf16.mxu1 %v895_v0 }
  0x7d   :  { %709 = vmatpush3.bf16.msra.mxu0 %v708_v53 }
  0x7e   :  { %710 = vmatprep.subr.bf16.mxu0 %v895_v0 }
  0x81   :  { %712 = vmatpush3.bf16.msra.mxu0 %v711_v60 }
 0x137   :  { %v181_v55 = vpop.f32.mrb[0].mxu0 }
 0x138   :  { %v182_v56 = vadd.f32 %v482_v54, %v181_v55  ;;  %v553_v57 = vpop.f32.mrb[1].mxu0 }
 0x13a   :  { %587 = vmatmul.mubr.f32.vlgmr.msra.gmra.mrb[0].mxu1 %v182_v56 }
 0x13b   :  { %656 = vmatprep.mubr.msk.f32.mxu1 %vm896_vm0, %v897_v1  ;;  %715 = vmatpush3.bf16.msra.mxu1 %v714_v2  ;;  %v377_v1 = vld [vmem:[#allocation10 + $0x30] sm:$0xff] }
 0x13c   :  { %716 = vmatprep.subr.bf16.mxu1 %v895_v0  ;;  %v723_v9 = vpack.c.bf16 %v378_v8, %v377_v1 }
 0x13f   :  { %718 = vmatpush3.bf16.msra.mxu1 %v717_v4 }
 0x140   :  { %719 = vmatprep.subr.bf16.mxu1 %v895_v0 }
 0x143   :  { %721 = vmatpush3.bf16.msra.mxu1 %v720_v7 }
 0x144   :  { %722 = vmatprep.subr.bf16.mxu1 %v895_v0 }
 0x147   :  { %724 = vmatpush3.bf16.msra.mxu1 %v723_v9 }
 0x148   :  { %725 = vmatprep.subr.bf16.mxu1 %v895_v0 }
 0x14b   :  { %727 = vmatpush3.bf16.msra.mxu1 %v726_v12 }
 0x14c   :  { %728 = vmatprep.subr.bf16.mxu1 %v895_v0 }
 0x14f   :  { %730 = vmatpush3.bf16.msra.mxu1 %v729_v15 }
 0x150   :  { %731 = vmatprep.subr.bf16.mxu1 %v895_v0 }
 0x153   :  { %733 = vmatpush3.bf16.msra.mxu1 %v732_v18 }
 0x154   :  { %734 = vmatprep.subr.bf16.mxu1 %v895_v0  ;;  %v486_v0 = vld [vmem:[%s1087_s8] ss:$0 sm:$0xff] }
 0x157   :  { %736 = vmatpush3.bf16.msra.mxu1 %v735_v25 }
 0x20d   :  { %v274_v20 = vpop.f32.mrb[0].mxu1 }
 0x20e   :  { %v275_v21 = vadd.f32 %v484_v19, %v274_v20  ;;  %v588_v22 = vpop.f32.mrb[1].mxu1 }
 0x210   :  { %622 = vmatmul.mubr.f32.vlgmr.msra.gmra.mrb[2].mxu0 %v275_v21 }
 0x2e3   :  { %v367_v27 = vpop.f32.mrb[2].mxu0 }
 0x2e4   :  { %v368_v28 = vadd.f32 %v485_v26, %v367_v27  ;;  %v623_v29 = vpop.f32.mrb[3].mxu0 }
 0x2e6   :  { %657 = vmatmul.mubr.f32.vlgmr.msra.gmra.mrb[2].mxu1 %v368_v28 }
 0x3b9   :  { %v460_v30 = vpop.f32.mrb[2].mxu1 }
 0x3ba   :  { %v461_v31 = vadd.f32 %v486_v0, %v460_v30  ;;  %v658_v32 = vpop.f32.mrb[3].mxu1 }
 0x3bc   :  { %464 = vst [vmem:[#allocation11] sm:$0xff] %v461_v31 }
 0x3bd   :  { %869 = shalt.err (!%p866_p2)
}
 0x3be   :  { %s870_s10 = scalar_lea.hbm %s1088_s9, 128 }
 0x3bf   :  { %p871_p3 = scmp.ne.s32.totalorder %s1088_s9, %s870_s10  ;;  %p874_p4 = scmp.lt.u32.totalorder %s870_s10, %s1088_s9 }
 0x3c1   :  { %p876_p5 = pnand %p874_p4, %p871_p3 }
 0x3c3   :  { %879 = shalt.err (!%p876_p5)
}
 0x3c4   :  { %474 = dma.vmem_to_hbm [thread:$0]  %s472_s12, 128, %s1088_s9, [#allocation4]  }
 0x3c5   :  { %886 = dma.done.wait [#allocation4], 128  }
 0x3c6   :  { %887 = vsyncadd [#allocation4], 4294967168 }
 0x3c7   :  { %478 = vsyncpa [#allocation3], 1 }
 0x3c8   :  { %479 = vsyncpa [#allocation6], 1 }
 0x3c9   :  { %480 = vsyncpa [#allocation9], 1 }
 0x3ca   :  { %481 = vsyncpa [#allocation4], 1 }

</bundles_post_ra>
